<compile_context>
chip_gen: v7x
topology: tpu7x:2x2x1
jax: 0.10.0
libtpu: 0.0.40
codegen_flags: <defaults>
</compile_context>

<pallas_src>
import functools

import jax
import jax.numpy as jnp
from jax import lax
from jax.experimental import pallas as pl
from jax.experimental.pallas import tpu as pltpu

_LANES = 128


def _epe_partial_kernel(pred_ref, gt_ref, out_ref, *, rows_valid, block_rows,
                        chunk_rows, num_chunks, mask_tail):
    """One grid step: EPE partial-sum over a (1, 2, block_rows, 128) tile.

    pred_ref / gt_ref : (1, 2, block_rows, 128) VMEM tiles (u = channel 0, v = 1)
    out_ref           : (1, 1, 8, 128) lane-dense partial sum for this block
    """
    t = pl.program_id(1)
    base_row = t * block_rows

    def body(j, acc):
        off = pl.multiple_of(j * chunk_rows, chunk_rows)
        up = pred_ref[0, 0, pl.ds(off, chunk_rows), :].astype(jnp.float32)
        vp = pred_ref[0, 1, pl.ds(off, chunk_rows), :].astype(jnp.float32)
        ug = gt_ref[0, 0, pl.ds(off, chunk_rows), :].astype(jnp.float32)
        vg = gt_ref[0, 1, pl.ds(off, chunk_rows), :].astype(jnp.float32)
        du = up - ug
        dv = vp - vg
        epe = jnp.sqrt(du * du + dv * dv)            # EUP slot; VPU does the rest
        if mask_tail:
            # Only the ragged last grid block actually needs this; padded rows of a
            # partial block read unspecified data, so select (not multiply) to 0.
            rows = base_row + off + lax.broadcasted_iota(
                jnp.int32, (chunk_rows, _LANES), 0)
            epe = jnp.where(rows < rows_valid, epe, 0.0)
        # Fold sublane-groups of 8 with pure VPU adds into the vreg-shaped accumulator.
        return acc + jnp.sum(epe.reshape(chunk_rows // 8, 8, _LANES), axis=0)

    acc = lax.fori_loop(0, num_chunks, body, jnp.zeros((8, _LANES), jnp.float32))
    out_ref[...] = acc[None, None, :, :]


def flow_epe_loss(input_data, flow_pred, *, block_rows=2048, chunk_rows=256):
    """Pallas-backed flow loss: mean end-point error.

    input_data: dict with 'flow_gt' of shape (N, 2, H, W)   (NCHW, like PyTorch)
    flow_pred : (N, 2, H, W); f32 or bf16 (math is f32 in-kernel).
    """
    flow_gt = input_data['flow_gt']
    N, C, H, W = flow_pred.shape
    assert C == 2, "EPE flow loss expects 2 flow channels (u, v)"
    assert flow_gt.shape == flow_pred.shape
    P = N * H * W                      # number of real pixels (normalizer)
    HW = H * W

    # Lane-dense no-copy view (N, 2, R, 128).  Falls back to a zero-pad copy only
    # when H*W is not a multiple of 128 or the image is tiny (< 1024 px); padded
    # pixels are zero in BOTH arrays so they contribute exactly 0 to the sum.
    R = max(pl.cdiv(HW, _LANES), 8)
    HW_pad = R * _LANES

    def to_view(x):
        x = x.reshape(N, 2, HW)
        if HW_pad != HW:
            # TODO(synk): padding copy; only hit when H*W % 128 != 0 or H*W < 1024.
            x = jnp.pad(x, ((0, 0), (0, 0), (0, HW_pad - HW)))
        return x.reshape(N, 2, R, _LANES)

    pred4 = to_view(flow_pred)
    gt4 = to_view(flow_gt)

    # Tile sizing: rows per block (multiple of 8 sublanes), chunk dividing it.
    br = max(8, (min(block_rows, R) // 8) * 8)
    num_t = pl.cdiv(R, br)
    ch = next(c for c in (chunk_rows, 256, 128, 64, 32, 16, 8)
              if 0 < c <= br and br % c == 0 and c % 8 == 0)
    num_chunks = br // ch
    mask_tail = (R % br) != 0

    kernel = functools.partial(
        _epe_partial_kernel,
        rows_valid=R, block_rows=br, chunk_rows=ch,
        num_chunks=num_chunks, mask_tail=mask_tail)

    in_spec = pl.BlockSpec((1, 2, br, _LANES), lambda n, t: (n, 0, t, 0))
    out_spec = pl.BlockSpec((1, 1, 8, _LANES), lambda n, t: (n, t, 0, 0))

    in_bytes = (pred4.size * jnp.dtype(pred4.dtype).itemsize
                + gt4.size * jnp.dtype(gt4.dtype).itemsize)
    out_bytes = N * num_t * 8 * _LANES * 4
    cost = pl.CostEstimate(flops=6 * P, transcendentals=P,
                           bytes_accessed=in_bytes + out_bytes)

    partials = pl.pallas_call(
        kernel,
        out_shape=jax.ShapeDtypeStruct((N, num_t, 8, _LANES), jnp.float32),
        grid_spec=pltpu.PrefetchScalarGridSpec(
            num_scalar_prefetch=0,
            grid=(N, num_t),
            in_specs=[in_spec, in_spec],
            out_specs=out_spec,
        ),
        compiler_params=pltpu.CompilerParams(
            # Per-block partials -> no cross-step carry -> both axes parallel
            # (splits across v7x's two TensorCores).  Raise vmem_limit_bytes if
            # block_rows is pushed past ~4096 with f32 inputs.
            dimension_semantics=("parallel", "parallel")),
        cost_estimate=cost,
    )(pred4, gt4)

    # Tiny final tree reduction + normalization in plain JAX.
    loss = jnp.sum(partials) / jnp.float32(P)
    return {'loss': loss, 'stats': {'epe': loss}}


class MultiLoss:
    """JAX re-implementation of the PyTorch MultiLoss aggregator."""

    def __init__(self, flow_loss):
        self.flow_loss = flow_loss

    def __call__(self, input_data, output):
        loss = jnp.float32(0.0)
        stats = {}
        if self.flow_loss is not None:
            flow = self.flow_loss(input_data, output['flow_pred'])
            loss = loss + flow['loss']
            stats = {**stats, **flow['stats']}
        stats = {**stats, 'loss': loss}
        return {'loss': loss, 'stats': stats}


if __name__ == "__main__":
    key = jax.random.PRNGKey(0)

    def epe_reference(pred, gt):
        d = pred.astype(jnp.float32) - gt.astype(jnp.float32)
        return jnp.mean(jnp.sqrt(jnp.sum(d * d, axis=1)))

    def check(name, pred, gt, **kwargs):
        got = flow_epe_loss({'flow_gt': gt}, pred, **kwargs)['loss']
        jax.block_until_ready(got)
        ref = epe_reference(pred, gt)
        assert jnp.allclose(got, ref, rtol=1e-5, atol=1e-6), (name, got, ref)

    # --- primary: module-level interface (batch=2, 2 flow channels, 32x32) ---
    k1, k2 = jax.random.split(key)
    N, C, H, W = 2, 2, 32, 32
    flow_gt = jax.random.normal(k1, (N, C, H, W), dtype=jnp.float32)
    flow_pred = jax.random.normal(k2, (N, C, H, W), dtype=jnp.float32)
    input_data = {'flow_gt': flow_gt}
    output = {'flow_pred': flow_pred}

    multi_loss = MultiLoss(flow_epe_loss)
    result = multi_loss(input_data, output)
    jax.block_until_ready(result['loss'])
    ref = epe_reference(flow_pred, flow_gt)
    assert jnp.allclose(result['loss'], ref, rtol=1e-5, atol=1e-6), (result['loss'], ref)
    assert jnp.allclose(result['stats']['loss'], result['loss'])

    # --- bf16 inputs + multi-chunk inner fori_loop (R=288 rows, 9 chunks) ---
    k3, k4 = jax.random.split(k1)
    p = jax.random.normal(k3, (2, 2, 192, 192), dtype=jnp.float32).astype(jnp.bfloat16)
    g = jax.random.normal(k4, (2, 2, 192, 192), dtype=jnp.float32).astype(jnp.bfloat16)
    check("bf16_multichunk", p, g)

    # --- ragged grid tail exercises the in-kernel row mask (R=20, block=16) ---
    k5, k6 = jax.random.split(k2)
    p = jax.random.normal(k5, (1, 2, 40, 64), dtype=jnp.float32)
    g = jax.random.normal(k6, (1, 2, 40, 64), dtype=jnp.float32)
    check("masked_tail", p, g, block_rows=16)

    # --- H*W not a multiple of 128 -> zero-pad fallback path ---
    k7, k8 = jax.random.split(k3)
    p = jax.random.normal(k7, (2, 2, 20, 30), dtype=jnp.float32)
    g = jax.random.normal(k8, (2, 2, 20, 30), dtype=jnp.float32)
    check("pad_fallback", p, g)

    print("KERNEL_OK")
</pallas_src>

<mosaic_0001>
module attributes {stable_mosaic.version = 11 : i64} {
  func.func @_epe_partial_kernel(%arg0: i32, %arg1: i32, %arg2: memref<1x2x8x128xf32, #tpu.memory_space<vmem>>, %arg3: memref<1x2x8x128xf32, #tpu.memory_space<vmem>>, %arg4: memref<1x1x8x128xf32, #tpu.memory_space<vmem>>) attributes {dimension_semantics = [#tpu.dimension_semantics<parallel>, #tpu.dimension_semantics<parallel>], iteration_bounds = array<i64: 2, 1>, scalar_prefetch = 0 : i64, scratch_operands = 0 : i64, tpu.core_type = #tpu.core_type<tc>, window_params = [{transform_indices = @transform_0, window_bounds = array<i64: 1, 2, 8, 128>}, {transform_indices = @transform_1, window_bounds = array<i64: 1, 2, 8, 128>}, {transform_indices = @transform_2, window_bounds = array<i64: 1, 1, 8, 128>}]} {
    %cst = arith.constant 0.000000e+00 : f32
    %0 = vector.broadcast %cst : f32 to vector<8x128xf32>
    %c0_i32 = arith.constant 0 : i32
    %c8_i32 = arith.constant 8 : i32
    %1 = arith.muli %c0_i32, %c8_i32 : i32
    %2 = tpu.assume_multiple %1, 8 : i32
    %c0 = arith.constant 0 : index
    %c0_0 = arith.constant 0 : index
    %3 = arith.index_cast %2 : i32 to index
    %c0_1 = arith.constant 0 : index
    %4 = vector.load %arg2[%c0, %c0_0, %3, %c0_1] : memref<1x2x8x128xf32, #tpu.memory_space<vmem>>, vector<1x1x8x128xf32>
    %5 = vector.shape_cast %4 : vector<1x1x8x128xf32> to vector<8x128xf32>
    %c0_2 = arith.constant 0 : index
    %c1 = arith.constant 1 : index
    %6 = arith.index_cast %2 : i32 to index
    %c0_3 = arith.constant 0 : index
    %7 = vector.load %arg2[%c0_2, %c1, %6, %c0_3] : memref<1x2x8x128xf32, #tpu.memory_space<vmem>>, vector<1x1x8x128xf32>
    %8 = vector.shape_cast %7 : vector<1x1x8x128xf32> to vector<8x128xf32>
    %c0_4 = arith.constant 0 : index
    %c0_5 = arith.constant 0 : index
    %9 = arith.index_cast %2 : i32 to index
    %c0_6 = arith.constant 0 : index
    %10 = vector.load %arg3[%c0_4, %c0_5, %9, %c0_6] : memref<1x2x8x128xf32, #tpu.memory_space<vmem>>, vector<1x1x8x128xf32>
    %11 = vector.shape_cast %10 : vector<1x1x8x128xf32> to vector<8x128xf32>
    %c0_7 = arith.constant 0 : index
    %c1_8 = arith.constant 1 : index
    %12 = arith.index_cast %2 : i32 to index
    %c0_9 = arith.constant 0 : index
    %13 = vector.load %arg3[%c0_7, %c1_8, %12, %c0_9] : memref<1x2x8x128xf32, #tpu.memory_space<vmem>>, vector<1x1x8x128xf32>
    %14 = vector.shape_cast %13 : vector<1x1x8x128xf32> to vector<8x128xf32>
    %15 = arith.subf %5, %11 : vector<8x128xf32>
    %16 = arith.subf %8, %14 : vector<8x128xf32>
    %17 = arith.mulf %15, %15 : vector<8x128xf32>
    %18 = arith.mulf %16, %16 : vector<8x128xf32>
    %19 = arith.addf %17, %18 : vector<8x128xf32>
    %20 = math.sqrt %19 : vector<8x128xf32>
    %21 = vector.shape_cast %20 : vector<8x128xf32> to vector<1x8x128xf32>
    %cst_10 = arith.constant dense<0.000000e+00> : vector<8x128xf32>
    %22 = vector.multi_reduction <add>, %21, %cst_10 [0] : vector<1x8x128xf32> to vector<8x128xf32>
    %23 = arith.addf %0, %22 : vector<8x128xf32>
    %c1_i32 = arith.constant 1 : i32
    %24 = vector.shape_cast %23 : vector<8x128xf32> to vector<1x1x8x128xf32>
    %c0_11 = arith.constant 0 : index
    %c0_12 = arith.constant 0 : index
    %c0_13 = arith.constant 0 : index
    %c0_14 = arith.constant 0 : index
    %25 = vector.load %arg4[%c0_11, %c0_12, %c0_13, %c0_14] : memref<1x1x8x128xf32, #tpu.memory_space<vmem>>, vector<1x1x8x128xf32>
    tpu.vector_store %arg4[%c0_11, %c0_12, %c0_13, %c0_14], %24 {strides = array<i32>} : memref<1x1x8x128xf32, #tpu.memory_space<vmem>>, vector<1x1x8x128xf32>,
    return
  }
  func.func @transform_0(%arg0: i32, %arg1: i32) -> (i32, i32, i32, i32) {
    %c0_i32 = arith.constant 0 : i32
    %c0_i32_0 = arith.constant 0 : i32
    %c0_i32_1 = arith.constant 0 : i32
    return %arg0, %c0_i32, %arg1, %c0_i32_0 : i32, i32, i32, i32
  }
  func.func @transform_1(%arg0: i32, %arg1: i32) -> (i32, i32, i32, i32) {
    %c0_i32 = arith.constant 0 : i32
    %c0_i32_0 = arith.constant 0 : i32
    %c0_i32_1 = arith.constant 0 : i32
    return %arg0, %c0_i32, %arg1, %c0_i32_0 : i32, i32, i32, i32
  }
  func.func @transform_2(%arg0: i32, %arg1: i32) -> (i32, i32, i32, i32) {
    %c0_i32 = arith.constant 0 : i32
    %c0_i32_0 = arith.constant 0 : i32
    %c0_i32_1 = arith.constant 0 : i32
    return %arg0, %arg1, %c0_i32, %c0_i32_0 : i32, i32, i32, i32
  }
}

</mosaic_0001>

<bundles_post_ra>
// kernel: tpu_custom_call.1
= control target key start
LH: loop header
LB: loop body
LE: loop exit
PB: predicated region body
PF: predicated region fallthrough
CT: control target
= control target key end

     0   :  { %7 = vsyncpa [#allocation3], 0  ;;  %s863_s0 = inlined_call_operand.hbm [shape: f32[2,2,8,128], index: 0, kind: input, shape index: {}]   ;;  %s864_s1 = inlined_call_operand.hbm [shape: f32[2,2,8,128], index: 1, kind: input, shape index: {}]   ;;  %s865_s2 = inlined_call_operand.hbm [shape: f32[2,1,8,128], index: 2, kind: output, shape index: {}]  }
   0x1   :  { %9 = vsyncpa [#allocation3 + $0x1], 0 }
   0x2   :  { %10 = vsyncpa [#allocation6], 0 }
   0x3   :  { %12 = vsyncpa [#allocation6 + $0x1], 0 }
   0x4   :  { %13 = vsyncpa [#allocation4], 0 }
   0x5   :  { %15 = vsyncpa [#allocation4 + $0x1], 0  ;;  %s628_s9 = smov 0   ;;  %s630_s10 = smov 0  }
   0x6   :  { %s632_s11 = smov 0   ;;  %s634_s12 = smov 0  }
   0x7   :  { %s636_s13 = smov 0   ;;  %s638_s14 = smov 0  }
   0x8 LB: > { %s367_s15 = sadd.s32 4294967295, %s606_s14   ;;  %s368_s16 = sadd.s32 4294967294, %s606_s14   ;;  %s606_s14 = sphi %s638_s14, %s21_s14   ;;  %s602_s13 = sphi %s636_s13, %s883_s13   ;;  %s598_s12 = sphi %s634_s12, %s882_s12   ;;  %s594_s11 = sphi %s632_s11, %s881_s11   ;;  %s590_s10 = sphi %s630_s10, %s880_s10   ;;  %s586_s9 = sphi %s628_s9, %s879_s9  }
   0x9   : > { %s33_s17 = sadd.s32 1, %s602_s13  ;;  %s42_s18 = sadd.s32 1, %s594_s11 }
   0xa   : > { %p35_p0 = scmp.ge.s32.totalorder %s33_s17, 2  ;;  %p49_p1 = scmp.ne.s32.totalorder %s594_s11, %s590_s10 }
   0xb   : > { %p50_p2 = scmp.eq.s32.totalorder %s606_s14, 0  ;;  %p55_p3 = scmp.ne.s32.totalorder %s590_s10, %s586_s9 }
   0xc   : > { %s885_s17 = smov (%p35_p0, %s33_s17), 0  ;;  %p56_p5 = scmp.eq.s32.totalorder %s367_s15, 0 }
   0xd   : > { %p669_p4 = por %p50_p2, %p49_p1  ;;  %s37_s20 = ssub.s32 %s602_s13, %s885_s17 }
   0xe   : > { %p109_p6 = scmp.eq.s32.totalorder %s367_s15, 1  ;;  %p40_p7 = scmp.eq.s32.totalorder %s37_s20, 0 }
   0xf   : > { %p675_p8 = por %p56_p5, %p55_p3  ;;  %p115_p10 = scmp.eq.s32.totalorder %s368_s16, 1 }
  0x10   : > { %p679_p9 = por %p109_p6, %p49_p1  ;;  %p406_p13 = scmp.lt.s32.totalorder %s606_s14, 2 }
  0x11   : > { %s869_s21 = scalar_select %p675_p8, 1, 0 }
  0x12   : > { %s870_s22 = scalar_select %p679_p9, 1, 0 }
  0x13   : > { %s684_s23 = scalar_select %p40_p7, %s594_s11, %s42_s18  }
  0x14   : > { %p686_p11 = por %p115_p10, %p55_p3  ;;  %s693_s25 = sand.u32 1, %s594_s11  }
  0x15   : > { %s371_s26 = sshll.u32 %s693_s25, 4  ;;  %s387_s27 = sshll.u32 %s602_s13, 8 }
  0x16   : > { %s871_s24 = scalar_select %p686_p11, 1, 0 }
  0x17   : > { %s702_s30 = scalar_lea.hbm %s863_s0, %s387_s27  ;;  %s139_s3 = scalar_lea.vmem [#allocation2], %s371_s26 }
  0x18   : > { %s147_s4 = sshll.u32 %s139_s3, 4  ;;  %p710_p0 = pnand %p406_p13, %p669_p4  ;;  %s706_s4 = int_to_ptr.vmem [resolvable:$true] %s147_s4 }
  0x19   : > { %s136_s6 = scalar_lea.sflag [#allocation3], %s693_s25  ;;  %s460_s7 = scalar_lea.hbm %s702_s30, 256 }
  0x1a   : > { %p461_p2 = scmp.ne.s32.totalorder %s702_s30, %s460_s7  ;;  %p462_p3 = pneg %p710_p0 }
  0x1b   : > { %s465_s16 = scalar_lea.hbm %s863_s0, 512  ;;  %p466_p4 = scmp.lt.u32.totalorder %s702_s30, %s863_s0 }
  0x1c   : > { %p463_p5 = pnand %p462_p3, %p461_p2  ;;  %p467_p7 = scmp.lt.u32.totalorder %s465_s16, %s460_s7 }
  0x1d   : > { %p469_p13 = scmp.lt.u32.totalorder %s460_s7, %s702_s30 }
  0x1e   : > { %p464_p6 = pneg %p463_p5  ;;  %p468_p10 = por %p467_p7, %p466_p4 }
  0x20   : > { %p470_p12 = por %p469_p13, %p468_p10 }
  0x22   : > { %p471_p1 = pnand %p470_p12, %p464_p6 }
  0x24   : > { %474 = shalt.err (!%p471_p1)
}
  0x25   : > { %s475_s20 = scalar_lea.vmem %s706_s4, 256  ;;  %s608_s28 = smov [#allocation2]  }
  0x26   : > { %p476_p2 = scmp.ne.s32.totalorder %s706_s4, %s475_s20  ;;  %s480_s29 = sshll.u32 %s608_s28, 4  ;;  %s481_s29 = int_to_ptr.vmem [resolvable:$false] %s480_s29 }
  0x27   : > { %s482_s3 = scalar_lea.vmem %s481_s29, 512  ;;  %p483_p9 = scmp.lt.s32.totalorder %s706_s4, %s481_s29 }
  0x28   : > { %p478_p5 = pnand %p476_p2, %p462_p3  ;;  %p484_p4 = scmp.lt.s32.totalorder %s482_s3, %s475_s20 }
  0x2a   : > { %p479_p11 = pneg %p478_p5  ;;  %p485_p7 = por %p484_p4, %p483_p9 }
  0x2c   : > { %p486_p10 = pnand %p485_p7, %p479_p11 }
  0x2e   : > { %489 = shalt.err (!%p486_p10)
}
  0x2f   : > { %s609_s7 = smov 128   ;;  %s610_s8 = smov 8  }
  0x30   : > { %398 = dma.hbm_to_vmem [thread:$0]  (!%p710_p0), %s702_s30, 256, %s706_s4, %s136_s6, %s609_s7, %s609_s7, %s610_s8  }
  0x31   : > { %p177_p9 = scmp.lt.s32.totalorder %s606_s14, 3  ;;  %s752_s18 = scalar_lea.hbm %s864_s1, %s387_s27 }
  0x32   : > { %p873_p11 = scmp.ge.s32.totalorder %s606_s14, 1  ;;  %s161_s20 = scalar_lea.vmem [#allocation5], %s371_s26 }
  0x33   : > { %s169_s28 = sshll.u32 %s161_s20, 4  ;;  %s158_s30 = scalar_lea.sflag [#allocation6], %s693_s25  ;;  %s762_s28 = int_to_ptr.vmem [resolvable:$true] %s169_s28 }
  0x34   : > { %p756_p12 = pnand %p873_p11, %p177_p9  ;;  %s490_s4 = scalar_lea.hbm %s752_s18, 256 }
  0x35   : > { %p491_p1 = scmp.ne.s32.totalorder %s752_s18, %s490_s4  ;;  %s495_s29 = scalar_lea.hbm %s864_s1, 512 }
  0x36   : > { %p496_p2 = scmp.lt.u32.totalorder %s752_s18, %s864_s1  ;;  %p497_p5 = scmp.lt.u32.totalorder %s495_s29, %s490_s4 }
  0x37   : > { %p493_p6 = pnand %p491_p1, %p462_p3  ;;  %p499_p7 = scmp.lt.u32.totalorder %s490_s4, %s752_s18 }
  0x38   : > { %p498_p4 = por %p497_p5, %p496_p2 }
  0x39   : > { %p494_p13 = pneg %p493_p6 }
  0x3a   : > { %p500_p10 = por %p499_p7, %p498_p4 }
  0x3c   : > { %p501_p9 = pnand %p500_p10, %p494_p13 }
  0x3e   : > { %504 = shalt.err (!%p501_p9)
}
  0x3f   : > { %s505_s26 = scalar_lea.vmem %s762_s28, 256  ;;  %s611_s16 = smov [#allocation5]  }
  0x40   : > { %p506_p11 = scmp.ne.s32.totalorder %s762_s28, %s505_s26  ;;  %s510_s20 = sshll.u32 %s611_s16, 4  ;;  %s511_s20 = int_to_ptr.vmem [resolvable:$false] %s510_s20 }
  0x41   : > { %s512_s27 = scalar_lea.vmem %s511_s20, 512  ;;  %p513_p8 = scmp.lt.s32.totalorder %s762_s28, %s511_s20 }
  0x42   : > { %p508_p1 = pnand %p506_p11, %p462_p3  ;;  %p514_p2 = scmp.lt.s32.totalorder %s512_s27, %s505_s26 }
  0x44   : > { %p509_p6 = pneg %p508_p1  ;;  %p515_p5 = por %p514_p2, %p513_p8 }
  0x46   : > { %p516_p4 = pnand %p515_p5, %p509_p6 }
  0x48   : > { %519 = shalt.err (!%p516_p4)
}
  0x49   : > { %401 = dma.hbm_to_vmem [thread:$0]  (!%p710_p0), %s752_s18, 256, %s762_s28, %s158_s30, %s609_s7, %s609_s7, %s610_s8  }
  0x4a   : > { %181 = sbr.rel (%p756_p12) target bundleno = 121 (0x79), region = 28  ;;  %s796_s4 = sand.u32 (!%p756_p12), 1, %s590_s10  }
  0x4b   : > { %s378_s6 = sshll.u32 (!%p756_p12), %s796_s4, 4  ;;  %s184_s29 = scalar_lea.sflag (!%p756_p12), [#allocation3], %s796_s4 }
  0x4c   : > { %s187_s5 = scalar_lea.vmem (!%p756_p12), [#allocation2], %s378_s6  ;;  %p875_p8 = scmp.ne.s32.totalorder (!%p756_p12), %s869_s21, 0 }
  0x51   : > { %573 = dma.done.wait (%p875_p8), %s184_s29, 256  }
  0x52   : > { %575 = vsyncadd (%p875_p8), %s184_s29, 4294967040  ;;  %s193_s25 = scalar_lea.sflag [#allocation6], %s796_s4  ;;  %s196_s7 = scalar_lea.vmem [#allocation5], %s378_s6 }
  0x53   : > { %577 = dma.done.wait (%p875_p8), %s193_s25, 256  }
  0x54   : > { %579 = vsyncadd (%p875_p8), %s193_s25, 4294967040  ;;  %v222_v0 = vld [vmem:[%s187_s5] sm:$0xff]  ;;  %v381_v1 = vld [vmem:[%s187_s5 + $0x8] sm:$0xff]  ;;  %s380_s8 = sshll.u32 %s796_s4, 3  ;;  %s384_s19 = sshll.u32 %s598_s12, 7 }
  0x55   : > { %v226_v2 = vld [vmem:[%s196_s7] sm:$0xff]  ;;  %v382_v3 = vld [vmem:[%s196_s7 + $0x8] sm:$0xff]  ;;  %s221_s21 = scalar_lea.vmem [#allocation7], %s380_s8  ;;  %s816_s3 = scalar_lea.hbm %s865_s2, %s384_s19 }
  0x56   : > { %v229_v4 = vsub.f32 %v222_v0, %v226_v2  ;;  %v230_v5 = vsub.f32 %v381_v1, %v382_v3  ;;  %s259_s18 = sshll.u32 %s221_s21, 4  ;;  %s245_s15 = scalar_lea.sflag [#allocation4], %s796_s4  ;;  %s811_s18 = int_to_ptr.vmem [resolvable:$true] %s259_s18 }
  0x57   : > { %s520_s26 = scalar_lea.vmem %s811_s18, 128  ;;  %p876_p3 = scmp.ne.s32.totalorder %s870_s22, 0 }
  0x58   : > { %v231_v6 = vmul.f32 %v229_v4, %v229_v4  ;;  %v232_v7 = vmul.f32 %v230_v5, %v230_v5  ;;  %p521_p0 = scmp.ne.s32.totalorder %s811_s18, %s520_s26  ;;  %s612_s12 = smov [#allocation7]  }
  0x59   : > { %s524_s16 = sshll.u32 %s612_s12, 4  ;;  %s525_s16 = int_to_ptr.vmem [resolvable:$false] %s524_s16 }
  0x5a   : > { %v233_v8 = vadd.f32 %v232_v7, %v231_v6  ;;  %p522_p12 = pnand %p521_p0, %p876_p3  ;;  %s526_s20 = scalar_lea.vmem %s525_s16, 256 }
  0x5b   : > { %p527_p7 = scmp.lt.s32.totalorder %s811_s18, %s525_s16  ;;  %p528_p10 = scmp.lt.s32.totalorder %s526_s20, %s520_s26 }
  0x5c   : > { %458 = vrsqrt.f32 %v233_v8  ;;  %vm236_vm0 = vcmp.eq.f32.partialorder %v233_v8, inf  ;;  %v239_v10 = vand.u32 2147483648, %v233_v8  ;;  %vm238_vm1 = vcmp.eq.f32.partialorder %v233_v8, 0.0  ;;  %p523_p13 = pneg %p522_p12 }
  0x5d   : > { %p529_p9 = por %p528_p10, %p527_p7 }
  0x5f   : > { %p530_p11 = pnand %p529_p9, %p523_p13 }
  0x66   : > { %v459_v9 = vpop.eup %458 }
  0x67   : > { %v235_v11 = vmul.f32 %v459_v9, %v233_v8 }
  0x69   : > { %v237_v12 = vsel %vm236_vm0, %v233_v8, %v235_v11 }
  0x6a   : > { %v240_v13 = vsel %vm238_vm1, %v239_v10, %v237_v12 }
  0x6b   : > { %243 = vst [vmem:[%s221_s21] sm:$0xff] %v240_v13 }
  0x6c   : > { %533 = shalt.err (!%p530_p11)
}
  0x6d   : > { %s534_s27 = scalar_lea.hbm %s816_s3, 128  ;;  %s538_s29 = scalar_lea.hbm %s865_s2, 256 }
  0x6e   : > { %p535_p1 = scmp.ne.s32.totalorder %s816_s3, %s534_s27  ;;  %p539_p5 = scmp.lt.u32.totalorder %s816_s3, %s865_s2 }
  0x6f   : > { %p540_p4 = scmp.lt.u32.totalorder %s538_s29, %s534_s27  ;;  %p542_p0 = scmp.lt.u32.totalorder %s534_s27, %s816_s3 }
  0x70   : > { %p536_p6 = pnand %p535_p1, %p876_p3 }
  0x71   : > { %p541_p8 = por %p540_p4, %p539_p5 }
  0x72   : > { %p537_p2 = pneg %p536_p6 }
  0x73   : > { %p543_p12 = por %p542_p0, %p541_p8 }
  0x75   : > { %p544_p13 = pnand %p543_p12, %p537_p2 }
  0x77   : > { %547 = shalt.err (!%p544_p13)
}
  0x78   : > { %393 = dma.vmem_to_hbm [thread:$0]  (%p876_p3), %s811_s18, 128, %s816_s3, %s245_s15  }
  0x79 PF: > { %s271_s7 = sand.u32 1, %s586_s9   ;;  %p877_p7 = scmp.ne.s32.totalorder %s871_s24, 0 }
  0x7a   : > { %p878_p10 = scmp.ge.s32.totalorder %s606_s14, 2  ;;  %s272_s8 = scalar_lea.sflag [#allocation4], %s271_s7 }
  0x7c   : > { %p403_p9 = pnand %p878_p10, %p877_p7 }
  0x7e   : > { %581 = dma.done.wait (!%p403_p9), %s272_s8, 128  }
  0x7f   : > { %583 = vsyncadd (!%p403_p9), %s272_s8, 4294967168  ;;  %s21_s14 = sadd.s32 1, %s606_s14   ;;  %s879_s9 = smov %s590_s10 }
  0x80   : > { %p18_p11 = scmp.ge.s32.totalorder %s21_s14, 4   ;;  %s880_s10 = smov %s594_s11 }
  0x81   : > { %s881_s11 = smov %s684_s23  ;;  %s882_s12 = smov %s602_s13 }
  0x82   : > { %s883_s13 = smov %s885_s17  ;;  %20 = sbr.rel (!%p18_p11) target bundleno = 8 (0x8), region = 88 }
  0x89   :  { %277 = vsyncpa [#allocation3], 1 }
  0x8a   :  { %279 = vsyncpa [#allocation3 + $0x1], 1 }
  0x8b   :  { %280 = vsyncpa [#allocation6], 1 }
  0x8c   :  { %282 = vsyncpa [#allocation6 + $0x1], 1 }
  0x8d   :  { %283 = vsyncpa [#allocation4], 1 }
  0x8e   :  { %285 = vsyncpa [#allocation4 + $0x1], 1 }

</bundles_post_ra>
